<compile_context>
chip_gen: v5e
topology: v5e:2x2
jax: 0.10.0
libtpu: 0.0.40
codegen_flags: <defaults>
</compile_context>

<pallas_src>
import numpy as np
import jax
import jax.numpy as jnp
from jax.experimental import pallas as pl
from jax.experimental.pallas import tpu as pltpu


def _interp_matrix_np(s_in: int, scale: int) -> np.ndarray:
    """(s_out, s_in) linear interpolation matrix, PyTorch align_corners=False."""
    s_out = s_in * scale
    j = np.arange(s_out, dtype=np.float64)
    # src = (dst + 0.5) * (in/out) - 0.5, clamped at 0 (PyTorch area_pixel rule)
    src = np.maximum((j + 0.5) * (float(s_in) / float(s_out)) - 0.5, 0.0)
    i0 = np.minimum(np.floor(src).astype(np.int64), s_in - 1)
    i1 = np.minimum(i0 + 1, s_in - 1)
    lam = src - i0
    m = np.zeros((s_out, s_in), dtype=np.float64)
    m[np.arange(s_out), i0] += 1.0 - lam
    m[np.arange(s_out), i1] += lam   # i0 == i1 at the right edge -> weights sum to 1
    return m


def _weight_array(m64: np.ndarray) -> jnp.ndarray:
    """f32 weights, stored as bf16 only when the cast is exactly lossless."""
    m32 = np.ascontiguousarray(m64, dtype=np.float32)
    mbf = m32.astype(jnp.bfloat16)
    if np.array_equal(mbf.astype(np.float32), m32):
        return jnp.asarray(mbf)          # lossless (e.g. scale=2: {0, .25, .75, 1})
    return jnp.asarray(m32)


def _pick_batch(nc: int, d: int, h: int, w: int, s: int) -> int:
    """Largest slab-batch B (divisor of nc) that keeps >= 2 grid steps (v7x dual
    TensorCore) and fits a conservative VMEM budget sized for v7x's 64 MiB."""
    v = d * h * w * 4                       # one f32 input slab
    so = s ** 3
    # double-buffered in/out blocks + fused-pass intermediates (rough upper bound)
    per_slab = 2 * v + 2 * so * v + (1 + 2 * s + 3 * s * s + 2 * so) * v
    budget = 24 * 1024 * 1024
    best = 1
    for b in range(1, nc + 1):
        if nc % b:
            continue
        if nc >= 2 and nc // b < 2:
            break                           # keep the parallel axis length >= 2
        if b * per_slab > budget:
            break
        best = b
        if b * so * v >= 8 * 1024 * 1024:   # output block already large enough
            break
    return best


def _make_kernel(B: int, D: int, H: int, W: int, s: int):
    Ho, Wo = H * s, W * s

    def kernel(x_ref, whT_ref, wwT_ref, o_ref):
        # x_ref   : (B*D, H, W)        input slab batch
        # whT_ref : (H, Ho)            H-axis interpolation (transposed)
        # wwT_ref : (W, Wo)            W-axis interpolation (transposed)
        # o_ref   : (B*D, s, Ho, Wo)   output; depth factored as (D, s) -> Do outside
        x = x_ref[...].astype(jnp.float32)                       # (B*D, H, W)
        wh = whT_ref[...].astype(jnp.float32)                    # exact if bf16 weights
        ww = wwT_ref[...].astype(jnp.float32)

        # ---- H pass: bring H to the lane axis, one big-M MXU matmul ----------
        t = jnp.swapaxes(x, 1, 2)                                # (B*D, W, H)
        t = jnp.dot(t.reshape(B * D * W, H), wh,
                    preferred_element_type=jnp.float32)          # (B*D*W, Ho)

        # ---- W pass: bring W back to the lane axis, big-M MXU matmul ---------
        t = jnp.swapaxes(t.reshape(B * D, W, Ho), 1, 2)          # (B*D, Ho, W)
        t = jnp.dot(t.reshape(B * D * Ho, W), ww,
                    preferred_element_type=jnp.float32)          # (B*D*Ho, Wo)
        t = t.reshape(B, D, Ho, Wo)

        # ---- D pass on the VPU: output depth s*m+r is a static 2-tap blend of
        #      input depths (m-1 | m | m+1), with edge clamping ----------------
        if D > 1:
            prev = jnp.concatenate([t[:, :1], t[:, :-1]], axis=1)  # depth m-1 (clamped)
            nxt = jnp.concatenate([t[:, 1:], t[:, -1:]], axis=1)   # depth m+1 (clamped)
        else:
            prev = nxt = t
        for r in range(s):                                        # static unroll
            f = (r + 0.5) / s - 0.5                               # |f| < 0.5
            if f >= 0.0:
                blend = (1.0 - f) * t + f * nxt
            else:
                blend = (-f) * prev + (1.0 + f) * t
            o_ref[:, r, :, :] = blend.reshape(B * D, Ho, Wo).astype(o_ref.dtype)

    return kernel


def upsample_trilinear(x: jnp.ndarray, scale_factor: int = 2) -> jnp.ndarray:
    """x: (N, C, D, H, W) -> (N, C, D*s, H*s, W*s); PyTorch trilinear, align_corners=False."""
    # TODO(synk): only mode='trilinear' (the module default) with a positive
    # integer scale_factor is implemented; 'nearest'/'linear'/'bilinear' are not.
    if int(scale_factor) != scale_factor or scale_factor < 1:
        raise NotImplementedError("only positive integer scale_factor is supported")
    s = int(scale_factor)
    N, C, D, H, W = x.shape
    Do, Ho, Wo = D * s, H * s, W * s
    NC = N * C

    whT = _weight_array(_interp_matrix_np(H, s).T)   # (H, Ho)
    wwT = _weight_array(_interp_matrix_np(W, s).T)   # (W, Wo)

    B = _pick_batch(NC, D, H, W, s)
    grid = (NC // B,)

    xf = x.reshape(NC * D, H, W)                     # free, contiguous

    out = pl.pallas_call(
        _make_kernel(B, D, H, W, s),
        out_shape=jax.ShapeDtypeStruct((NC * D, s, Ho, Wo), x.dtype),
        grid_spec=pltpu.PrefetchScalarGridSpec(
            num_scalar_prefetch=0,
            grid=grid,
            in_specs=[
                pl.BlockSpec((B * D, H, W), lambda i: (i, 0, 0)),
                pl.BlockSpec((H, Ho), lambda i: (0, 0)),
                pl.BlockSpec((W, Wo), lambda i: (0, 0)),
            ],
            out_specs=pl.BlockSpec((B * D, s, Ho, Wo), lambda i: (i, 0, 0, 0)),
        ),
        compiler_params=pltpu.CompilerParams(
            dimension_semantics=("parallel",),
            vmem_limit_bytes=64 * 1024 * 1024,
        ),
    )(xf, whT, wwT)

    # (NC*D, s, Ho, Wo) -> (N, C, D*s, Ho, Wo): row-major, depth index = d*s + r.
    return out.reshape(N, C, Do, Ho, Wo)


if __name__ == "__main__":
    key = jax.random.PRNGKey(0)
    # Small 5-D input consistent with mode='trilinear' (NCDHW).
    x = jax.random.normal(key, (2, 4, 8, 8, 8), dtype=jnp.float32)

    y = upsample_trilinear(x, scale_factor=2)
    y = jax.block_until_ready(y)

    # Independent reference: half-pixel trilinear resize (matches PyTorch
    # interpolate(..., mode='trilinear', align_corners=False)).
    ref = jax.image.resize(x, (2, 4, 16, 16, 16), method="trilinear")

    assert y.shape == (2, 4, 16, 16, 16), y.shape
    assert jnp.allclose(y, ref, atol=1e-5, rtol=1e-5), "mismatch vs reference"
    print("KERNEL_OK")
</pallas_src>

<mosaic_0001>
module attributes {stable_mosaic.version = 11 : i64} {
  func.func @kernel(%arg0: i32, %arg1: memref<32x8x8xf32, #tpu.memory_space<vmem>>, %arg2: memref<8x16xbf16, #tpu.memory_space<vmem>>, %arg3: memref<8x16xbf16, #tpu.memory_space<vmem>>, %arg4: memref<32x2x16x16xf32, #tpu.memory_space<vmem>>) attributes {dimension_semantics = [#tpu.dimension_semantics<parallel>], iteration_bounds = array<i64: 2>, scalar_prefetch = 0 : i64, scratch_operands = 0 : i64, tpu.core_type = #tpu.core_type<tc>, window_params = [{transform_indices = @transform_0, window_bounds = array<i64: 32, 8, 8>}, {pipeline_mode = #tpu.pipeline_mode<synchronous>, transform_indices = @transform_1, window_bounds = array<i64: 8, 16>}, {pipeline_mode = #tpu.pipeline_mode<synchronous>, transform_indices = @transform_2, window_bounds = array<i64: 8, 16>}, {transform_indices = @transform_3, window_bounds = array<i64: 32, 2, 16, 16>}]} {
    %c0 = arith.constant 0 : index
    %c0_0 = arith.constant 0 : index
    %c0_1 = arith.constant 0 : index
    %0 = vector.load %arg1[%c0, %c0_0, %c0_1] : memref<32x8x8xf32, #tpu.memory_space<vmem>>, vector<32x8x8xf32>
    %c0_2 = arith.constant 0 : index
    %c0_3 = arith.constant 0 : index
    %1 = vector.load %arg2[%c0_2, %c0_3] : memref<8x16xbf16, #tpu.memory_space<vmem>>, vector<8x16xbf16>
    %2 = arith.extf %1 : vector<8x16xbf16> to vector<8x16xf32>
    %c0_4 = arith.constant 0 : index
    %c0_5 = arith.constant 0 : index
    %3 = vector.load %arg3[%c0_4, %c0_5] : memref<8x16xbf16, #tpu.memory_space<vmem>>, vector<8x16xbf16>
    %4 = arith.extf %3 : vector<8x16xbf16> to vector<8x16xf32>
    %5 = tpu.transpose %0, [0, 2, 1] : vector<32x8x8xf32> -> vector<32x8x8xf32>
    %6 = vector.shape_cast %5 : vector<32x8x8xf32> to vector<256x8xf32>
    %cst = arith.constant dense<0.000000e+00> : vector<256x16xf32>
    %7 = tpu.matmul %6, %2, %cst {dimension_numbers = #tpu.dot_dimension_numbers<[1], [0], [0], [1], [0, 0, 1, 1], [], []>} : vector<256x8xf32>, vector<8x16xf32>, vector<256x16xf32> -> vector<256x16xf32>
    %8 = vector.shape_cast %7 : vector<256x16xf32> to vector<32x8x16xf32>
    %9 = tpu.transpose %8, [0, 2, 1] : vector<32x8x16xf32> -> vector<32x16x8xf32>
    %10 = vector.shape_cast %9 : vector<32x16x8xf32> to vector<512x8xf32>
    %cst_6 = arith.constant dense<0.000000e+00> : vector<512x16xf32>
    %11 = tpu.matmul %10, %4, %cst_6 {dimension_numbers = #tpu.dot_dimension_numbers<[1], [0], [0], [1], [0, 0, 1, 1], [], []>} : vector<512x8xf32>, vector<8x16xf32>, vector<512x16xf32> -> vector<512x16xf32>
    %12 = vector.shape_cast %11 : vector<512x16xf32> to vector<4x8x16x16xf32>
    %13 = vector.extract_strided_slice %12 {offsets = [0, 0, 0, 0], sizes = [4, 1, 16, 16], strides = [1, 1, 1, 1]} : vector<4x8x16x16xf32> to vector<4x1x16x16xf32>
    %14 = vector.extract_strided_slice %12 {offsets = [0, 0, 0, 0], sizes = [4, 7, 16, 16], strides = [1, 1, 1, 1]} : vector<4x8x16x16xf32> to vector<4x7x16x16xf32>
    %15 = tpu.concatenate %13, %14 in 1 : vector<4x1x16x16xf32>, vector<4x7x16x16xf32> -> vector<4x8x16x16xf32>
    %16 = vector.extract_strided_slice %12 {offsets = [0, 1, 0, 0], sizes = [4, 7, 16, 16], strides = [1, 1, 1, 1]} : vector<4x8x16x16xf32> to vector<4x7x16x16xf32>
    %17 = vector.extract_strided_slice %12 {offsets = [0, 7, 0, 0], sizes = [4, 1, 16, 16], strides = [1, 1, 1, 1]} : vector<4x8x16x16xf32> to vector<4x1x16x16xf32>
    %18 = tpu.concatenate %16, %17 in 1 : vector<4x7x16x16xf32>, vector<4x1x16x16xf32> -> vector<4x8x16x16xf32>
    %cst_7 = arith.constant 2.500000e-01 : f32
    %19 = vector.broadcast %cst_7 : f32 to vector<4x8x16x16xf32>
    %20 = arith.mulf %19, %15 : vector<4x8x16x16xf32>
    %cst_8 = arith.constant 7.500000e-01 : f32
    %21 = vector.broadcast %cst_8 : f32 to vector<4x8x16x16xf32>
    %22 = arith.mulf %21, %12 : vector<4x8x16x16xf32>
    %23 = arith.addf %20, %22 : vector<4x8x16x16xf32>
    %24 = vector.shape_cast %23 : vector<4x8x16x16xf32> to vector<32x16x16xf32>
    %c0_9 = arith.constant 0 : index
    %c0_10 = arith.constant 0 : index
    %c0_11 = arith.constant 0 : index
    %c0_12 = arith.constant 0 : index
    %25 = vector.load %arg4[%c0_9, %c0_10, %c0_11, %c0_12] : memref<32x2x16x16xf32, #tpu.memory_space<vmem>>, vector<32x1x16x16xf32>
    %26 = vector.shape_cast %25 : vector<32x1x16x16xf32> to vector<32x16x16xf32>
    %27 = vector.shape_cast %24 : vector<32x16x16xf32> to vector<32x1x16x16xf32>
    tpu.vector_store %arg4[%c0_9, %c0_10, %c0_11, %c0_12], %27 {strides = array<i32>} : memref<32x2x16x16xf32, #tpu.memory_space<vmem>>, vector<32x1x16x16xf32>,
    %cst_13 = arith.constant 7.500000e-01 : f32
    %28 = vector.broadcast %cst_13 : f32 to vector<4x8x16x16xf32>
    %29 = arith.mulf %28, %12 : vector<4x8x16x16xf32>
    %cst_14 = arith.constant 2.500000e-01 : f32
    %30 = vector.broadcast %cst_14 : f32 to vector<4x8x16x16xf32>
    %31 = arith.mulf %30, %18 : vector<4x8x16x16xf32>
    %32 = arith.addf %29, %31 : vector<4x8x16x16xf32>
    %33 = vector.shape_cast %32 : vector<4x8x16x16xf32> to vector<32x16x16xf32>
    %c0_15 = arith.constant 0 : index
    %c1 = arith.constant 1 : index
    %c0_16 = arith.constant 0 : index
    %c0_17 = arith.constant 0 : index
    %34 = vector.load %arg4[%c0_15, %c1, %c0_16, %c0_17] : memref<32x2x16x16xf32, #tpu.memory_space<vmem>>, vector<32x1x16x16xf32>
    %35 = vector.shape_cast %34 : vector<32x1x16x16xf32> to vector<32x16x16xf32>
    %36 = vector.shape_cast %33 : vector<32x16x16xf32> to vector<32x1x16x16xf32>
    tpu.vector_store %arg4[%c0_15, %c1, %c0_16, %c0_17], %36 {strides = array<i32>} : memref<32x2x16x16xf32, #tpu.memory_space<vmem>>, vector<32x1x16x16xf32>,
    return
  }
  func.func @transform_0(%arg0: i32) -> (i32, i32, i32) {
    %c0_i32 = arith.constant 0 : i32
    %c0_i32_0 = arith.constant 0 : i32
    %c0_i32_1 = arith.constant 0 : i32
    return %arg0, %c0_i32, %c0_i32_0 : i32, i32, i32
  }
  func.func @transform_1(%arg0: i32) -> (i32, i32) {
    %c0_i32 = arith.constant 0 : i32
    %c0_i32_0 = arith.constant 0 : i32
    %c0_i32_1 = arith.constant 0 : i32
    return %c0_i32, %c0_i32_0 : i32, i32
  }
  func.func @transform_2(%arg0: i32) -> (i32, i32) {
    %c0_i32 = arith.constant 0 : i32
    %c0_i32_0 = arith.constant 0 : i32
    %c0_i32_1 = arith.constant 0 : i32
    return %c0_i32, %c0_i32_0 : i32, i32
  }
  func.func @transform_3(%arg0: i32) -> (i32, i32, i32, i32) {
    %c0_i32 = arith.constant 0 : i32
    %c0_i32_0 = arith.constant 0 : i32
    %c0_i32_1 = arith.constant 0 : i32
    %c0_i32_2 = arith.constant 0 : i32
    return %arg0, %c0_i32, %c0_i32_0, %c0_i32_1 : i32, i32, i32, i32
  }
}

</mosaic_0001>

<bundles_post_ra>
// kernel: tpu_custom_call.1
= control target key start
LH: loop header
LB: loop body
LE: loop exit
PB: predicated region body
PF: predicated region fallthrough
CT: control target
= control target key end

     0   :  { %s3528_s12 = smov 0   ;;  %s3975_s0 = inlined_call_operand.vmem [shape: f32[64,8,8], index: 0, kind: input, shape index: {}]   ;;  %s3976_s1 = inlined_call_operand.vmem [shape: bf16[8,16], index: 1, kind: input, shape index: {}]   ;;  %s3977_s2 = inlined_call_operand.vmem [shape: bf16[8,16], index: 2, kind: input, shape index: {}]   ;;  %s3978_s3 = inlined_call_operand.vmem [shape: f32[64,2,16,16], index: 3, kind: output, shape index: {}]  }
   0x1 LB: > { %s3315_s13 = sadd.s32 4294967295, %s3506_s12   ;;  %p3319_p0 = scmp.ge.s32.totalorder %s3506_s12, 1  ;;  %s3506_s12 = sphi %s3528_s12, %s13_s12  }
   0x2   : > { %p138_p1 = scmp.lt.s32.totalorder %s3506_s12, 3 }
   0x4   : > { %p139_p2 = pnand %p3319_p0, %p138_p1 }
   0x5   : > { %s3320_s14 = sshll.u32 (!%p139_p2), %s3315_s13, 5 }
   0x6   : > { %142 = sbr.rel (%p139_p2) target bundleno = 1043 (0x413), region = 32  ;;  %p164_p3 = scmp.lt.s32.totalorder (!%p139_p2), %s3320_s14, 63 }
   0xb   : > { %s3980_s14 = smov (!%p164_p3, %s3320_s14), 63  ;;  %v208_v6 = vld [vmem:[%s3976_s1] sm:$0xf]  ;;  %vm1236_vm0 = vcmask 64512   ;;  %vm3055_vm1 = vcmask 130048  }
   0xc   : > { %s3321_s15 = sshll.u32 %s3980_s14, 3  ;;  %v209_v7 = vunpack.c.l.bf16 %v208_v6  ;;  %s3487_s23 = sshll.u32 %s3980_s14, 5 }
   0xd   : > { %s3542_s18 = scalar_lea.vmem %s3975_s0, %s3321_s15  ;;  %s3638_s26 = scalar_lea.vmem %s3978_s3, %s3487_s23 }
   0xe   : > { %v176_v0 = vld [vmem:[%s3542_s18] sm:$0xff]  ;;  %v178_v1 = vld [vmem:[%s3542_s18 + $0x10] sm:$0xff]  ;;  %v177_v3 = vld [vmem:[%s3542_s18 + $0x8] sm:$0xff]  ;;  %1348 = vmatpush.msra.mxu0 %v209_v7  ;;  %3488 = vmatpush.msra.mxu3 %v209_v7 }
   0xf   : > { %212 = vxpose.xlu0.b32.start.end [1/1] (short) (narrow) %v176_v0, 8  ;;  %276 = vxpose.xlu1.b32.start.end [1/1] (short) (narrow) %v178_v1, 8  ;;  %v180_v2 = vld [vmem:[%s3542_s18 + $0x20] sm:$0xff]  ;;  %v179_v4 = vld [vmem:[%s3542_s18 + $0x18] sm:$0xff]  ;;  %v181_v5 = vld [vmem:[%s3542_s18 + $0x28] sm:$0xff] }
  0x10   : > { %340 = vxpose.xlu2.b32.start.end [1/1] (short) (narrow) %v180_v2, 8  ;;  %v182_v8 = vld [vmem:[%s3542_s18 + $0x30] sm:$0xff]  ;;  %v183_v9 = vld [vmem:[%s3542_s18 + $0x38] sm:$0xff]  ;;  %v184_v10 = vld [vmem:[%s3542_s18 + $0x40] sm:$0xff] }
  0x11   : > { %v185_v11 = vld [vmem:[%s3542_s18 + $0x48] sm:$0xff]  ;;  %v186_v12 = vld [vmem:[%s3542_s18 + $0x50] sm:$0xff]  ;;  %v187_v13 = vld [vmem:[%s3542_s18 + $0x58] sm:$0xff] }
  0x12   : > { %v188_v14 = vld [vmem:[%s3542_s18 + $0x60] sm:$0xff]  ;;  %v189_v15 = vld [vmem:[%s3542_s18 + $0x68] sm:$0xff]  ;;  %v190_v16 = vld [vmem:[%s3542_s18 + $0x70] sm:$0xff] }
  0x13   : > { %v191_v17 = vld [vmem:[%s3542_s18 + $0x78] sm:$0xff]  ;;  %v192_v26 = vld [vmem:[%s3542_s18 + $0x80] sm:$0xff]  ;;  %v202_v28 = vld [vmem:[%s3542_s18 + $0xd0] sm:$0xff] }
  0x14   : > { %v195_v30 = vld [vmem:[%s3542_s18 + $0x98] sm:$0xff]  ;;  %v205_v32 = vld [vmem:[%s3542_s18 + $0xe8] sm:$0xff]  ;;  %v200_v35 = vld [vmem:[%s3542_s18 + $0xc0] sm:$0xff] }
  0x15   : > { %v201_v38 = vld [vmem:[%s3542_s18 + $0xc8] sm:$0xff]  ;;  %v194_v42 = vld [vmem:[%s3542_s18 + $0x90] sm:$0xff]  ;;  %v203_v45 = vld [vmem:[%s3542_s18 + $0xd8] sm:$0xff] }
  0x16   : > { %v193_v39 = vld [vmem:[%s3542_s18 + $0x88] sm:$0xff]  ;;  %v204_v48 = vld [vmem:[%s3542_s18 + $0xe0] sm:$0xff]  ;;  %v198_v56 = vld [vmem:[%s3542_s18 + $0xb0] sm:$0xff] }
  0x17   : > { %244 = vxpose.xlu0.b32.start.end [1/1] (short) (narrow) %v177_v3, 8  ;;  %308 = vxpose.xlu1.b32.start.end [1/1] (short) (narrow) %v179_v4, 8  ;;  %v196_v49 = vld [vmem:[%s3542_s18 + $0xa0] sm:$0xff]  ;;  %v197_v52 = vld [vmem:[%s3542_s18 + $0xa8] sm:$0xff]  ;;  %v206_v61 = vld [vmem:[%s3542_s18 + $0xf0] sm:$0xff] }
  0x18   : > { %372 = vxpose.xlu2.b32.start.end [1/1] (short) (narrow) %v181_v5, 8  ;;  %v207_v63 = vld [vmem:[%s3542_s18 + $0xf8] sm:$0xff] }
  0x19   : > { %v199_v1 = vld [vmem:[%s3542_s18 + $0xb8] sm:$0xff] }
  0x1f   : > { %404 = vxpose.xlu0.b32.start.end [1/1] (short) (narrow) %v182_v8, 8  ;;  %436 = vxpose.xlu1.b32.start.end [1/1] (short) (narrow) %v183_v9, 8 }
  0x20   : > { %468 = vxpose.xlu2.b32.start.end [1/1] (short) (narrow) %v184_v10, 8 }
  0x27   : > { %500 = vxpose.xlu0.b32.start.end [1/1] (short) (narrow) %v185_v11, 8  ;;  %532 = vxpose.xlu1.b32.start.end [1/1] (short) (narrow) %v186_v12, 8 }
  0x28   : > { %564 = vxpose.xlu2.b32.start.end [1/1] (short) (narrow) %v187_v13, 8 }
  0x2f   : > { %596 = vxpose.xlu0.b32.start.end [1/1] (short) (narrow) %v188_v14, 8  ;;  %628 = vxpose.xlu1.b32.start.end [1/1] (short) (narrow) %v189_v15, 8 }
  0x30   : > { %660 = vxpose.xlu2.b32.start.end [1/1] (short) (narrow) %v190_v16, 8  ;;  %v210_v16 = vld [vmem:[%s3977_s2] sm:$0xf] }
  0x37   : > { %692 = vxpose.xlu0.b32.start.end [1/1] (short) (narrow) %v191_v17, 8  ;;  %980 = vxpose.xlu1.b32.start.end [1/1] (short) (narrow) %v200_v35, 8  ;;  %v211_v17 = vunpack.c.l.bf16 %v210_v16 }
  0x38   : > { %724 = vxpose.xlu2.b32.start.end [1/1] (short) (narrow) %v192_v26, 8 }
  0x39   : > { %3489 = vmatpush.msra.mxu2 %v211_v17  ;;  %2677 = vmatpush.msra.mxu1 %v211_v17 }
  0x3a   : > { %3490 = vmatpush.msrb.mxu3 %v211_v17 }
  0x3f   : > { %1012 = vxpose.xlu0.b32.start.end [1/1] (short) (narrow) %v201_v38, 8  ;;  %756 = vxpose.xlu1.b32.start.end [1/1] (short) (narrow) %v193_v39, 8 }
  0x40   : > { %1044 = vxpose.xlu2.b32.start.end [1/1] (short) (narrow) %v202_v28, 8 }
  0x47   : > { %788 = vxpose.xlu0.b32.start.end [1/1] (short) (narrow) %v194_v42, 8  ;;  %1076 = vxpose.xlu1.b32.start.end [1/1] (short) (narrow) %v203_v45, 8 }
  0x48   : > { %820 = vxpose.xlu2.b32.start.end [1/1] (short) (narrow) %v195_v30, 8 }
  0x4f   : > { %1108 = vxpose.xlu0.b32.start.end [1/1] (short) (narrow) %v204_v48, 8  ;;  %852 = vxpose.xlu1.b32.start.end [1/1] (short) (narrow) %v196_v49, 8 }
  0x50   : > { %1140 = vxpose.xlu2.b32.start.end [1/1] (short) (narrow) %v205_v32, 8 }
  0x57   : > { %884 = vxpose.xlu1.b32.start.end [1/1] (short) (narrow) %v197_v52, 8 }
  0xa9   : > { %v356_v22 = vpop.trf.xlu2 }
  0xb1   : > { %v388_v23 = vpop.trf.xlu2 }
  0xb3   : > { %v228_v18 = vpop.trf.xlu0  ;;  %v292_v20 = vpop.trf.xlu1 }
  0xb4   : > { %3325 = vmatmul.msk.f32.vlgmr.msra.gmra.mxu0 %vm1236_vm0, %v228_v18 }
  0xb9   : > { %v484_v27 = vpop.trf.xlu2 }
  0xbb   : > { %v260_v19 = vpop.trf.xlu0  ;;  %v324_v21 = vpop.trf.xlu1 }
  0xbc   : > { %3326 = vmatmul.msk.f32.gmra.mxu0 %vm1236_vm0, %v260_v19 }
  0xc1   : > { %v580_v33 = vpop.trf.xlu2 }
  0xc3   : > { %v420_v24 = vpop.trf.xlu0  ;;  %v452_v25 = vpop.trf.xlu1 }
  0xc4   : > { %3327 = vmatmul.msk.f32.gmra.mxu0 %vm1236_vm0, %v292_v20 }
  0xc9   : > { %v676_v37 = vpop.trf.xlu2 }
  0xcb   : > { %v516_v29 = vpop.trf.xlu0  ;;  %v548_v31 = vpop.trf.xlu1 }
  0xcc   : > { %3328 = vmatmul.msk.f32.gmra.mxu0 %vm1236_vm0, %v324_v21 }
  0xd1   : > { %v740_v2 = vpop.trf.xlu2 }
  0xd3   : > { %v612_v34 = vpop.trf.xlu0  ;;  %v644_v36 = vpop.trf.xlu1 }
  0xd4   : > { %3329 = vmatmul.msk.f32.gmra.mxu0 %vm1236_vm0, %v356_v22 }
  0xd9   : > { %v1060_v6 = vpop.trf.xlu2 }
  0xdb   : > { %v708_v40 = vpop.trf.xlu0  ;;  %v996_v3 = vpop.trf.xlu1 }
  0xdc   : > { %3330 = vmatmul.msk.f32.gmra.mxu0 %vm1236_vm0, %v388_v23  ;;  %3349 = vmatmul.msk.f32.vlgmr.msra.gmra.mxu3 %vm1236_vm0, %v996_v3 }
  0xe1   : > { %v836_v8 = vpop.trf.xlu2 }
  0xe3   : > { %v1028_v4 = vpop.trf.xlu0  ;;  %v772_v5 = vpop.trf.xlu1 }
  0xe4   : > { %3331 = vmatmul.msk.f32.gmra.mxu0 %vm1236_vm0, %v420_v24  ;;  %3350 = vmatmul.msk.f32.gmra.mxu3 %vm1236_vm0, %v1028_v4 }
  0xe9   : > { %v1156_v12 = vpop.trf.xlu2 }
  0xeb   : > { %v804_v7 = vpop.trf.xlu0  ;;  %v1092_v9 = vpop.trf.xlu1 }
  0xec   : > { %3332 = vmatmul.msk.f32.gmra.mxu0 %vm1236_vm0, %v452_v25  ;;  %3351 = vmatmul.msk.f32.gmra.mxu3 %vm1236_vm0, %v1060_v6 }
  0xf3   : > { %v1124_v10 = vpop.trf.xlu0  ;;  %v868_v11 = vpop.trf.xlu1 }
  0xf4   : > { %3333 = vmatmul.msk.f32.gmra.mxu0 %vm1236_vm0, %v484_v27  ;;  %3352 = vmatmul.msk.f32.gmra.mxu3 %vm1236_vm0, %v1092_v9 }
  0xfb   : > { %v900_v13 = vpop.trf.xlu1 }
  0xfc   : > { %3334 = vmatmul.msk.f32.gmra.mxu0 %vm1236_vm0, %v516_v29  ;;  %3353 = vmatmul.msk.f32.gmra.mxu3 %vm1236_vm0, %v1124_v10 }
 0x104   : > { %3335 = vmatmul.msk.f32.gmra.mxu0 %vm1236_vm0, %v548_v31  ;;  %3354 = vmatmul.msk.f32.gmra.mxu3 %vm1236_vm0, %v1156_v12 }
 0x10c   : > { %3336 = vmatmul.msk.f32.gmra.mxu0 %vm1236_vm0, %v580_v33 }
 0x114   : > { %3337 = vmatmul.msk.f32.gmra.mxu0 %vm1236_vm0, %v612_v34 }
 0x11c   : > { %3338 = vmatmul.msk.f32.gmra.mxu0 %vm1236_vm0, %v644_v36 }
 0x124   : > { %3339 = vmatmul.msk.f32.gmra.mxu0 %vm1236_vm0, %v676_v37 }
 0x12c   : > { %3340 = vmatmul.msk.f32.gmra.mxu0 %vm1236_vm0, %v708_v40 }
 0x131   : > { %v1350_v41 = vpop.f32.mrf.mxu0 }
 0x132   : > { %1446 = vxpose.xlu2.b32.start.end [1/1] (short) (narrow) %v1350_v41, 16 }
 0x134   : > { %3341 = vmatmul.msk.f32.gmra.mxu0 %vm1236_vm0, %v740_v2 }
 0x139   : > { %v1353_v43 = vpop.f32.mrf.mxu0 }
 0x13c   : > { %3342 = vmatmul.msk.f32.gmra.mxu0 %vm1236_vm0, %v772_v5 }
 0x141   : > { %v1356_v44 = vpop.f32.mrf.mxu0 }
 0x142   : > { %916 = vxpose.xlu2.b32.start.end [1/1] (short) (narrow) %v198_v56, 8 }
 0x144   : > { %3343 = vmatmul.msk.f32.gmra.mxu0 %vm1236_vm0, %v804_v7 }
 0x149   : > { %v1359_v46 = vpop.f32.mrf.mxu0 }
 0x14c   : > { %3344 = vmatmul.msk.f32.gmra.mxu0 %vm1236_vm0, %v836_v8 }
 0x151   : > { %v1362_v47 = vpop.f32.mrf.mxu0 }
 0x154   : > { %3345 = vmatmul.msk.f32.gmra.mxu0 %vm1236_vm0, %v868_v11 }
 0x159   : > { %v1365_v50 = vpop.f32.mrf.mxu0 }
 0x15c   : > { %3346 = vmatmul.msk.f32.gmra.mxu0 %vm1236_vm0, %v900_v13 }
 0x15f   : > { %v1422_v21 = vpop.f32.mrf.mxu3 }
 0x161   : > { %v1368_v51 = vpop.f32.mrf.mxu0 }
 0x167   : > { %v1425_v29 = vpop.f32.mrf.mxu3 }
 0x169   : > { %v1371_v53 = vpop.f32.mrf.mxu0 }
 0x16f   : > { %v1428_v37 = vpop.f32.mrf.mxu3 }
 0x171   : > { %v1374_v54 = vpop.f32.mrf.mxu0 }
 0x179   : > { %v1377_v55 = vpop.f32.mrf.mxu0 }
 0x181   : > { %v1380_v57 = vpop.f32.mrf.mxu0 }
 0x189   : > { %v1383_v58 = vpop.f32.mrf.mxu0 }
 0x191   : > { %v1386_v59 = vpop.f32.mrf.mxu0 }
 0x192   : > { %1830 = vxpose.xlu0.b32.start.end [1/1] (short) (narrow) %v1386_v59, 16 }
 0x199   : > { %v1389_v60 = vpop.f32.mrf.mxu0 }
 0x19a   : > { %1862 = vxpose.xlu1.b32.start.end [1/1] (short) (narrow) %v1389_v60, 16 }
 0x1a1   : > { %v1392_v62 = vpop.f32.mrf.mxu0 }
 0x1a2   : > { %1172 = vxpose.xlu0.b32.start.end [1/1] (short) (narrow) %v206_v61, 8  ;;  %1894 = vxpose.xlu2.b32.start.end [1/1] (short) (narrow) %v1392_v62, 16 }
 0x1a9   : > { %v1395_v0 = vpop.f32.mrf.mxu0 }
 0x1aa   : > { %1204 = vxpose.xlu0.b32.start.end [1/1] (short) (narrow) %v207_v63, 8  ;;  %1478 = vxpose.xlu1.b32.start.end [1/1] (short) (narrow) %v1353_v43, 16 }
 0x1b1   : > { %v1398_v20 = vpop.f32.mrf.mxu0 }
 0x1b2   : > { %948 = vxpose.xlu0.b32.start.end [1/1] (short) (narrow) %v199_v1, 8  ;;  %1926 = vxpose.xlu2.b32.start.end [1/1] (short) (narrow) %v1395_v0, 16 }
 0x1b9   : > { %v1401_v28 = vpop.f32.mrf.mxu0 }
 0x1ba   : > { %1542 = vxpose.xlu0.b32.start.end [1/1] (short) (narrow) %v1359_v46, 16  ;;  %1510 = vxpose.xlu1.b32.start.end [1/1] (short) (narrow) %v1356_v44, 16  ;;  %v1431_v44 = vpop.f32.mrf.mxu3 }
 0x1c1   : > { %v1404_v36 = vpop.f32.mrf.mxu0 }
 0x1c2   : > { %1574 = vxpose.xlu2.b32.start.end [1/1] (short) (narrow) %v1362_v47, 16  ;;  %v1434_v48 = vpop.f32.mrf.mxu3 }
 0x1c9   : > { %v1407_v42 = vpop.f32.mrf.mxu0 }
 0x1ca   : > { %1958 = vxpose.xlu0.b32.start.end [1/1] (short) (narrow) %v1398_v20, 16  ;;  %2214 = vxpose.xlu1.b32.start.end [1/1] (short) (narrow) %v1422_v21, 16  ;;  %v1437_v52 = vpop.f32.mrf.mxu3 }
 0x1cb   : > { %v1462_v14 = vpop.trf.xlu2 }
 0x1cc   : > { %3357 = vmatmul.msk.f32.vlgmr.msra.gmra.mxu1 %vm1236_vm0, %v1462_v14 }
 0x1d1   : > { %v1410_v47 = vpop.f32.mrf.mxu0 }
 0x1d2   : > { %1606 = vxpose.xlu2.b32.start.end [1/1] (short) (narrow) %v1365_v50, 16 }
 0x1d3   : > { %v1463_v15 = vpop.trf.xlu2 }
 0x1d4   : > { %3358 = vmatmul.msk.f32.gmra.mxu1 %vm1236_vm0, %v1463_v15 }
 0x1da   : > { %1990 = vxpose.xlu0.b32.start.end [1/1] (short) (narrow) %v1401_v28, 16  ;;  %2246 = vxpose.xlu1.b32.start.end [1/1] (short) (narrow) %v1425_v29, 16 }
 0x1db   : > { %v932_v18 = vpop.trf.xlu2 }
 0x1dc   : > { %3347 = vmatmul.msk.f32.gmra.mxu0 %vm1236_vm0, %v932_v18 }
 0x1e2   : > { %1638 = vxpose.xlu2.b32.start.end [1/1] (short) (narrow) %v1368_v51, 16  ;;  %v1413_v51 = vpop.f32.mrf.mxu0 }
 0x1ea   : > { %2022 = vxpose.xlu0.b32.start.end [1/1] (short) (narrow) %v1404_v36, 16  ;;  %2278 = vxpose.xlu1.b32.start.end [1/1] (short) (narrow) %v1428_v37, 16 }
 0x1f2   : > { %1670 = vxpose.xlu2.b32.start.end [1/1] (short) (narrow) %v1371_v53, 16 }
 0x1fa   : > { %2054 = vxpose.xlu0.b32.start.end [1/1] (short) (narrow) %v1407_v42, 16  ;;  %2310 = vxpose.xlu1.b32.start.end [1/1] (short) (narrow) %v1431_v44, 16 }
 0x202   : > { %1702 = vxpose.xlu2.b32.start.end [1/1] (short) (narrow) %v1374_v54, 16 }
 0x20a   : > { %2086 = vxpose.xlu0.b32.start.end [1/1] (short) (narrow) %v1410_v47, 16  ;;  %2342 = vxpose.xlu1.b32.start.end [1/1] (short) (narrow) %v1434_v48, 16 }
 0x212   : > { %1734 = vxpose.xlu2.b32.start.end [1/1] (short) (narrow) %v1377_v55, 16 }
 0x21a   : > { %2118 = vxpose.xlu0.b32.start.end [1/1] (short) (narrow) %v1413_v51, 16  ;;  %2374 = vxpose.xlu1.b32.start.end [1/1] (short) (narrow) %v1437_v52, 16 }
 0x222   : > { %1766 = vxpose.xlu2.b32.start.end [1/1] (short) (narrow) %v1380_v57, 16 }
 0x232   : > { %1798 = vxpose.xlu2.b32.start.end [1/1] (short) (narrow) %v1383_v58, 16 }
 0x236   : > { %v1846_v19 = vpop.trf.xlu0 }
 0x237   : > { %3381 = vmatmul.msk.f32.vlgmr.msra.gmra.mxu2 %vm1236_vm0, %v1846_v19 }
 0x23b   : > { %v1910_v24 = vpop.trf.xlu2 }
 0x23e   : > { %v1878_v22 = vpop.trf.xlu1  ;;  %v1847_v23 = vpop.trf.xlu0 }
 0x23f   : > { %3382 = vmatmul.msk.f32.gmra.mxu2 %vm1236_vm0, %v1847_v23 }
 0x243   : > { %v1911_v27 = vpop.trf.xlu2 }
 0x246   : > { %v1879_v25 = vpop.trf.xlu1  ;;  %v1188_v26 = vpop.trf.xlu0 }
 0x247   : > { %3355 = vmatmul.msk.f32.gmra.mxu3 %vm1236_vm0, %v1188_v26  ;;  %3383 = vmatmul.msk.f32.gmra.mxu2 %vm1236_vm0, %v1878_v22 }
 0x249   : > { %v2679_v54 = vpop.f32.mrf.mxu1 }
 0x24a   : > { %v2871_v56 = vmul.f32 0.25, %v2679_v54  ;;  %v2927_v57 = vmul.f32 0.75, %v2679_v54 }
 0x24b   : > { %v1942_v32 = vpop.trf.xlu2 }
 0x24c   : > { %v2991_v59 = vadd.f32 %v2927_v57, %v2871_v56 }
 0x24e   : > { %v1494_v30 = vpop.trf.xlu1  ;;  %v1220_v31 = vpop.trf.xlu0  ;;  %3056 = vst.msk [vmem:[%s3638_s26] sm:$0xff] %vm3055_vm1, %v2991_v59 }
 0x24f   : > { %3359 = vmatmul.msk.f32.gmra.mxu1 %vm1236_vm0, %v1494_v30  ;;  %3384 = vmatmul.msk.f32.gmra.mxu2 %vm1236_vm0, %v1879_v25 }
 0x250   : > { %3356 = vmatmul.msk.f32.gmra.mxu3 %vm1236_vm0, %v1220_v31 }
 0x251   : > { %v2682_v60 = vpop.f32.mrf.mxu1 }
 0x252   : > { %v2872_v61 = vmul.f32 0.25, %v2682_v60  ;;  %v2928_v62 = vmul.f32 0.75, %v2682_v60 }
 0x253   : > { %v1943_v35 = vpop.trf.xlu2 }
 0x254   : > { %v2992_v63 = vadd.f32 %v2928_v62, %v2872_v61 }
 0x256   : > { %v1495_v33 = vpop.trf.xlu1  ;;  %v964_v34 = vpop.trf.xlu0  ;;  %3057 = vst.msk [vmem:[%s3638_s26 + $0x8] sm:$0xff] %vm3055_vm1, %v2992_v63 }
 0x257   : > { %3348 = vmatmul.msk.f32.gmra.mxu0 %vm1236_vm0, %v964_v34  ;;  %3360 = vmatmul.msk.f32.gmra.mxu1 %vm1236_vm0, %v1495_v33 }
 0x258   : > { %3385 = vmatmul.msk.f32.gmra.mxu2 %vm1236_vm0, %v1910_v24 }
 0x259   : > { %v1416_v55 = vpop.f32.mrf.mxu0 }
 0x25a   : > { %2150 = vxpose.xlu0.b32.start.end [1/1] (short) (narrow) %v1416_v55, 16 }
 0x25b   : > { %v1590_v39 = vpop.trf.xlu2 }
 0x25e   : > { %v1526_v38 = vpop.trf.xlu1  ;;  %v1558_v43 = vpop.trf.xlu0 }
 0x25f   : > { %3361 = vmatmul.msk.f32.gmra.mxu1 %vm1236_vm0, %v1526_v38 }
 0x260   : > { %3386 = vmatmul.msk.f32.gmra.mxu2 %vm1236_vm0, %v1911_v27 }
 0x263   : > { %v1591_v41 = vpop.trf.xlu2 }
 0x266   : > { %v1527_v40 = vpop.trf.xlu1  ;;  %v1559_v46 = vpop.trf.xlu0 }
 0x267   : > { %3362 = vmatmul.msk.f32.gmra.mxu1 %vm1236_vm0, %v1527_v40 }
 0x268   : > { %3387 = vmatmul.msk.f32.gmra.mxu2 %vm1236_vm0, %v1942_v32 }
 0x26b   : > { %v1622_v45 = vpop.trf.xlu2 }
 0x26e   : > { %v1974_v42 = vpop.trf.xlu0 }
 0x26f   : > { %3363 = vmatmul.msk.f32.gmra.mxu1 %vm1236_vm0, %v1558_v43 }
 0x270   : > { %3388 = vmatmul.msk.f32.gmra.mxu2 %vm1236_vm0, %v1943_v35 }
 0x273   : > { %v1623_v49 = vpop.trf.xlu2 }
 0x277   : > { %3364 = vmatmul.msk.f32.gmra.mxu1 %vm1236_vm0, %v1559_v46 }
 0x278   : > { %3389 = vmatmul.msk.f32.gmra.mxu2 %vm1236_vm0, %v1974_v42 }
 0x27b   : > { %v1654_v50 = vpop.trf.xlu2 }
 0x27f   : > { %3365 = vmatmul.msk.f32.gmra.mxu1 %vm1236_vm0, %v1590_v39 }
 0x283   : > { %v1655_v53 = vpop.trf.xlu2 }
 0x287   : > { %3366 = vmatmul.msk.f32.gmra.mxu1 %vm1236_vm0, %v1591_v41  ;;  %v2230_v41 = vpop.trf.xlu1 }
 0x288   : > { %3405 = vmatmul.msk.f32.vlgmr.msrb.gmra.mxu3 %vm1236_vm0, %v2230_v41 }
 0x28b   : > { %v1686_v58 = vpop.trf.xlu2 }
 0x28f   : > { %3367 = vmatmul.msk.f32.gmra.mxu1 %vm1236_vm0, %v1622_v45  ;;  %v2231_v48 = vpop.trf.xlu1 }
 0x290   : > { %3406 = vmatmul.msk.f32.gmra.mxu3 %vm1236_vm0, %v2231_v48 }
 0x293   : > { %v1687_v0 = vpop.trf.xlu2 }
 0x297   : > { %3368 = vmatmul.msk.f32.gmra.mxu1 %vm1236_vm0, %v1623_v49  ;;  %v1975_v49 = vpop.trf.xlu0 }
 0x298   : > { %3390 = vmatmul.msk.f32.gmra.mxu2 %vm1236_vm0, %v1975_v49 }
 0x29b   : > { %v1718_v1 = vpop.trf.xlu2 }
 0x29f   : > { %3369 = vmatmul.msk.f32.gmra.mxu1 %vm1236_vm0, %v1654_v50 }
 0x2a3   : > { %v1719_v2 = vpop.trf.xlu2 }
 0x2a7   : > { %3370 = vmatmul.msk.f32.gmra.mxu1 %vm1236_vm0, %v1655_v53 }
 0x2ab   : > { %v1750_v4 = vpop.trf.xlu2 }
 0x2af   : > { %3371 = vmatmul.msk.f32.gmra.mxu1 %vm1236_vm0, %v1686_v58 }
 0x2b3   : > { %v1751_v12 = vpop.trf.xlu2 }
 0x2b7   : > { %3372 = vmatmul.msk.f32.gmra.mxu1 %vm1236_vm0, %v1687_v0 }
 0x2ba   : > { %v2751_v3 = vpop.f32.mrf.mxu2 }
 0x2bb   : > { %v3650_v8 = vmul.f32 0.25, %v2751_v3  ;;  %v3652_v9 = vmul.f32 0.75, %v2751_v3  ;;  %v1782_v31 = vpop.trf.xlu2 }
 0x2bf   : > { %3373 = vmatmul.msk.f32.gmra.mxu1 %vm1236_vm0, %v1718_v1 }
 0x2c2   : > { %v2754_v5 = vpop.f32.mrf.mxu2 }
 0x2c3   : > { %v3671_v21 = vmul.f32 0.25, %v2754_v5  ;;  %v3673_v22 = vmul.f32 0.75, %v2754_v5  ;;  %v1783_v40 = vpop.trf.xlu2 }
 0x2c7   : > { %3374 = vmatmul.msk.f32.gmra.mxu1 %vm1236_vm0, %v1719_v2 }
 0x2ca   : > { %v1440_v6 = vpop.f32.mrf.mxu3  ;;  %v2757_v7 = vpop.f32.mrf.mxu2 }
 0x2cb   : > { %v3654_v10 = vmul.f32 0.25, %v2757_v7  ;;  %v3656_v11 = vmul.f32 0.75, %v2757_v7  ;;  %2406 = vxpose.xlu1.b32.start.end [1/1] (short) (narrow) %v1440_v6, 16  ;;  %v1814_v50 = vpop.trf.xlu2 }
 0x2cc   : > { %v2685_v13 = vpop.f32.mrf.mxu1 }
 0x2cd   : > { %v3017_v14 = vadd.f32 %v3656_v11, %v3650_v8  ;;  %v3152_v15 = vadd.f32 %v3652_v9, %v3654_v10  ;;  %v2873_v16 = vmul.f32 0.25, %v2685_v13  ;;  %v2929_v17 = vmul.f32 0.75, %v2685_v13 }
 0x2cf   : > { %3082 = vst.msk [vmem:[%s3638_s26 + $0x1a0] sm:$0xff] %vm3055_vm1, %v3017_v14  ;;  %v2993_v18 = vadd.f32 %v2929_v17, %v2871_v56  ;;  %v3128_v19 = vadd.f32 %v2927_v57, %v2873_v16  ;;  %3375 = vmatmul.msk.f32.gmra.mxu1 %vm1236_vm0, %v1750_v4  ;;  %v2262_v56 = vpop.trf.xlu1  ;;  %v2006_v57 = vpop.trf.xlu0 }
 0x2d0   : > { %3445 = vst.msk [vmem:[%s3638_s26 + $0x190] sm:$0xff] %vm3055_vm1, %v3152_v15  ;;  %3391 = vmatmul.msk.f32.gmra.mxu2 %vm1236_vm0, %v2006_v57  ;;  %3407 = vmatmul.msk.f32.gmra.mxu3 %vm1236_vm0, %v2262_v56 }
 0x2d1   : > { %3058 = vst.msk [vmem:[%s3638_s26 + $0x20] sm:$0xff] %vm3055_vm1, %v2993_v18 }
 0x2d2   : > { %3421 = vst.msk [vmem:[%s3638_s26 + $0x10] sm:$0xff] %vm3055_vm1, %v3128_v19  ;;  %v2760_v20 = vpop.f32.mrf.mxu2 }
 0x2d3   : > { %v3675_v23 = vmul.f32 0.25, %v2760_v20  ;;  %v3677_v24 = vmul.f32 0.75, %v2760_v20  ;;  %v1443_v34 = vpop.f32.mrf.mxu3  ;;  %v1815_v59 = vpop.trf.xlu2 }
 0x2d4   : > { %v1419_v25 = vpop.f32.mrf.mxu0  ;;  %v2688_v26 = vpop.f32.mrf.mxu1 }
 0x2d5   : > { %v3018_v27 = vadd.f32 %v3677_v24, %v3671_v21  ;;  %v3153_v28 = vadd.f32 %v3673_v22, %v3675_v23  ;;  %v2874_v29 = vmul.f32 0.25, %v2688_v26  ;;  %v2930_v30 = vmul.f32 0.75, %v2688_v26  ;;  %2182 = vxpose.xlu0.b32.start.end [1/1] (short) (narrow) %v1419_v25, 16 }
 0x2d7   : > { %3083 = vst.msk [vmem:[%s3638_s26 + $0x1a8] sm:$0xff] %vm3055_vm1, %v3018_v27  ;;  %v2994_v32 = vadd.f32 %v2930_v30, %v2872_v61  ;;  %v3129_v33 = vadd.f32 %v2928_v62, %v2874_v29  ;;  %3376 = vmatmul.msk.f32.gmra.mxu1 %vm1236_vm0, %v1751_v12  ;;  %v2263_v0 = vpop.trf.xlu1  ;;  %v2007_v1 = vpop.trf.xlu0 }
 0x2d8   : > { %3446 = vst.msk [vmem:[%s3638_s26 + $0x198] sm:$0xff] %vm3055_vm1, %v3153_v28  ;;  %3392 = vmatmul.msk.f32.gmra.mxu2 %vm1236_vm0, %v2007_v1  ;;  %3408 = vmatmul.msk.f32.gmra.mxu3 %vm1236_vm0, %v2263_v0 }
 0x2d9   : > { %3059 = vst.msk [vmem:[%s3638_s26 + $0x28] sm:$0xff] %vm3055_vm1, %v2994_v32 }
 0x2da   : > { %3422 = vst.msk [vmem:[%s3638_s26 + $0x18] sm:$0xff] %vm3055_vm1, %v3129_v33 }
 0x2db   : > { %2438 = vxpose.xlu1.b32.start.end [1/1] (short) (narrow) %v1443_v34, 16 }
 0x2dc   : > { %v2691_v35 = vpop.f32.mrf.mxu1 }
 0x2dd   : > { %v2875_v36 = vmul.f32 0.25, %v2691_v35  ;;  %v2931_v37 = vmul.f32 0.75, %v2691_v35 }
 0x2df   : > { %v2995_v38 = vadd.f32 %v2931_v37, %v2873_v16  ;;  %v3130_v39 = vadd.f32 %v2929_v17, %v2875_v36  ;;  %3377 = vmatmul.msk.f32.gmra.mxu1 %vm1236_vm0, %v1782_v31  ;;  %v2294_v7 = vpop.trf.xlu1  ;;  %v2038_v12 = vpop.trf.xlu0 }
 0x2e0   : > { %3393 = vmatmul.msk.f32.gmra.mxu2 %vm1236_vm0, %v2038_v12  ;;  %3409 = vmatmul.msk.f32.gmra.mxu3 %vm1236_vm0, %v2294_v7 }
 0x2e1   : > { %3060 = vst.msk [vmem:[%s3638_s26 + $0x40] sm:$0xff] %vm3055_vm1, %v2995_v38 }
 0x2e2   : > { %3423 = vst.msk [vmem:[%s3638_s26 + $0x30] sm:$0xff] %vm3055_vm1, %v3130_v39 }
 0x2e4   : > { %v2694_v43 = vpop.f32.mrf.mxu1 }
 0x2e5   : > { %v2876_v44 = vmul.f32 0.25, %v2694_v43  ;;  %v2932_v45 = vmul.f32 0.75, %v2694_v43 }
 0x2e7   : > { %v2996_v46 = vadd.f32 %v2932_v45, %v2874_v29  ;;  %v3131_v47 = vadd.f32 %v2930_v30, %v2876_v44  ;;  %3378 = vmatmul.msk.f32.gmra.mxu1 %vm1236_vm0, %v1783_v40  ;;  %v2295_v18 = vpop.trf.xlu1  ;;  %v2039_v19 = vpop.trf.xlu0 }
 0x2e8   : > { %3394 = vmatmul.msk.f32.gmra.mxu2 %vm1236_vm0, %v2039_v19  ;;  %3410 = vmatmul.msk.f32.gmra.mxu3 %vm1236_vm0, %v2295_v18 }
 0x2e9   : > { %3061 = vst.msk [vmem:[%s3638_s26 + $0x48] sm:$0xff] %vm3055_vm1, %v2996_v46 }
 0x2ea   : > { %3424 = vst.msk [vmem:[%s3638_s26 + $0x38] sm:$0xff] %vm3055_vm1, %v3131_v47 }
 0x2ec   : > { %v2697_v51 = vpop.f32.mrf.mxu1 }
 0x2ed   : > { %v2877_v52 = vmul.f32 0.25, %v2697_v51  ;;  %v2933_v53 = vmul.f32 0.75, %v2697_v51 }
 0x2ef   : > { %v2997_v54 = vadd.f32 %v2933_v53, %v2875_v36  ;;  %v3132_v55 = vadd.f32 %v2931_v37, %v2877_v52  ;;  %3379 = vmatmul.msk.f32.gmra.mxu1 %vm1236_vm0, %v1814_v50  ;;  %v2326_v29 = vpop.trf.xlu1  ;;  %v2070_v30 = vpop.trf.xlu0 }
 0x2f0   : > { %3395 = vmatmul.msk.f32.gmra.mxu2 %vm1236_vm0, %v2070_v30  ;;  %3411 = vmatmul.msk.f32.gmra.mxu3 %vm1236_vm0, %v2326_v29 }
 0x2f1   : > { %3062 = vst.msk [vmem:[%s3638_s26 + $0x60] sm:$0xff] %vm3055_vm1, %v2997_v54 }
 0x2f2   : > { %3425 = vst.msk [vmem:[%s3638_s26 + $0x50] sm:$0xff] %vm3055_vm1, %v3132_v55 }
 0x2f4   : > { %v2700_v58 = vpop.f32.mrf.mxu1 }
 0x2f5   : > { %v2878_v60 = vmul.f32 0.25, %v2700_v58  ;;  %v2934_v61 = vmul.f32 0.75, %v2700_v58 }
 0x2f7   : > { %v2998_v62 = vadd.f32 %v2934_v61, %v2876_v44  ;;  %v3133_v63 = vadd.f32 %v2932_v45, %v2878_v60  ;;  %3380 = vmatmul.msk.f32.gmra.mxu1 %vm1236_vm0, %v1815_v59  ;;  %v2327_v36 = vpop.trf.xlu1  ;;  %v2071_v37 = vpop.trf.xlu0 }
 0x2f8   : > { %3396 = vmatmul.msk.f32.gmra.mxu2 %vm1236_vm0, %v2071_v37  ;;  %3412 = vmatmul.msk.f32.gmra.mxu3 %vm1236_vm0, %v2327_v36 }
 0x2f9   : > { %3063 = vst.msk [vmem:[%s3638_s26 + $0x68] sm:$0xff] %vm3055_vm1, %v2998_v62 }
 0x2fa   : > { %3426 = vst.msk [vmem:[%s3638_s26 + $0x58] sm:$0xff] %vm3055_vm1, %v3133_v63 }
 0x2fc   : > { %v2703_v2 = vpop.f32.mrf.mxu1 }
 0x2fd   : > { %v2879_v3 = vmul.f32 0.25, %v2703_v2  ;;  %v2935_v4 = vmul.f32 0.75, %v2703_v2 }
 0x2ff   : > { %v2999_v5 = vadd.f32 %v2935_v4, %v2877_v52  ;;  %v3134_v6 = vadd.f32 %v2933_v53, %v2879_v3  ;;  %v2358_v43 = vpop.trf.xlu1  ;;  %v2102_v44 = vpop.trf.xlu0 }
 0x300   : > { %3397 = vmatmul.msk.f32.gmra.mxu2 %vm1236_vm0, %v2102_v44  ;;  %3413 = vmatmul.msk.f32.gmra.mxu3 %vm1236_vm0, %v2358_v43 }
 0x301   : > { %3064 = vst.msk [vmem:[%s3638_s26 + $0x80] sm:$0xff] %vm3055_vm1, %v2999_v5 }
 0x302   : > { %3427 = vst.msk [vmem:[%s3638_s26 + $0x70] sm:$0xff] %vm3055_vm1, %v3134_v6 }
 0x304   : > { %v2706_v13 = vpop.f32.mrf.mxu1 }
 0x305   : > { %v2880_v14 = vmul.f32 0.25, %v2706_v13  ;;  %v2936_v15 = vmul.f32 0.75, %v2706_v13 }
 0x307   : > { %v3000_v16 = vadd.f32 %v2936_v15, %v2878_v60  ;;  %v3135_v17 = vadd.f32 %v2934_v61, %v2880_v14  ;;  %v2359_v50 = vpop.trf.xlu1  ;;  %v2103_v51 = vpop.trf.xlu0 }
 0x308   : > { %3398 = vmatmul.msk.f32.gmra.mxu2 %vm1236_vm0, %v2103_v51  ;;  %3414 = vmatmul.msk.f32.gmra.mxu3 %vm1236_vm0, %v2359_v50 }
 0x309   : > { %3065 = vst.msk [vmem:[%s3638_s26 + $0x88] sm:$0xff] %vm3055_vm1, %v3000_v16 }
 0x30a   : > { %3428 = vst.msk [vmem:[%s3638_s26 + $0x78] sm:$0xff] %vm3055_vm1, %v3135_v17 }
 0x30c   : > { %v2709_v20 = vpop.f32.mrf.mxu1 }
 0x30d   : > { %v2881_v25 = vmul.f32 0.25, %v2709_v20  ;;  %v2937_v26 = vmul.f32 0.75, %v2709_v20 }
 0x30f   : > { %v3001_v27 = vadd.f32 %v2937_v26, %v2879_v3  ;;  %v3136_v28 = vadd.f32 %v2935_v4, %v2881_v25  ;;  %v2390_v58 = vpop.trf.xlu1  ;;  %v2134_v59 = vpop.trf.xlu0 }
 0x310   : > { %3399 = vmatmul.msk.f32.gmra.mxu2 %vm1236_vm0, %v2134_v59  ;;  %3415 = vmatmul.msk.f32.gmra.mxu3 %vm1236_vm0, %v2390_v58  ;;  %v2763_v4 = vpop.f32.mrf.mxu2 }
 0x311   : > { %3066 = vst.msk [vmem:[%s3638_s26 + $0xa0] sm:$0xff] %vm3055_vm1, %v3001_v27  ;;  %v2897_v5 = vmul.f32 0.25, %v2763_v4  ;;  %v2955_v6 = vmul.f32 0.75, %v2763_v4 }
 0x312   : > { %3429 = vst.msk [vmem:[%s3638_s26 + $0x90] sm:$0xff] %vm3055_vm1, %v3136_v28 }
 0x314   : > { %v2712_v31 = vpop.f32.mrf.mxu1 }
 0x315   : > { %v2882_v32 = vmul.f32 0.25, %v2712_v31  ;;  %v2938_v33 = vmul.f32 0.75, %v2712_v31 }
 0x317   : > { %v3002_v34 = vadd.f32 %v2938_v33, %v2880_v14  ;;  %v3137_v35 = vadd.f32 %v2936_v15, %v2882_v32  ;;  %v2391_v2 = vpop.trf.xlu1  ;;  %v2135_v3 = vpop.trf.xlu0  ;;  %v3019_v14 = vadd.f32 %v2955_v6, %v3654_v10  ;;  %v3154_v15 = vadd.f32 %v3656_v11, %v2897_v5 }
 0x318   : > { %3400 = vmatmul.msk.f32.gmra.mxu2 %vm1236_vm0, %v2135_v3  ;;  %3416 = vmatmul.msk.f32.gmra.mxu3 %vm1236_vm0, %v2391_v2  ;;  %v2766_v18 = vpop.f32.mrf.mxu2 }
 0x319   : > { %3067 = vst.msk [vmem:[%s3638_s26 + $0xa8] sm:$0xff] %vm3055_vm1, %v3002_v34  ;;  %v2898_v19 = vmul.f32 0.25, %v2766_v18  ;;  %v2956_v20 = vmul.f32 0.75, %v2766_v18 }
 0x31a   : > { %3430 = vst.msk [vmem:[%s3638_s26 + $0x98] sm:$0xff] %vm3055_vm1, %v3137_v35 }
 0x31b   : > { %3084 = vst.msk [vmem:[%s3638_s26 + $0x1c0] sm:$0xff] %vm3055_vm1, %v3019_v14  ;;  %v3155_v27 = vadd.f32 %v3677_v24, %v2898_v19 }
 0x31c   : > { %v2715_v38 = vpop.f32.mrf.mxu1  ;;  %3447 = vst.msk [vmem:[%s3638_s26 + $0x1b0] sm:$0xff] %vm3055_vm1, %v3154_v15 }
 0x31d   : > { %v2883_v39 = vmul.f32 0.25, %v2715_v38  ;;  %v2939_v40 = vmul.f32 0.75, %v2715_v38  ;;  %3448 = vst.msk [vmem:[%s3638_s26 + $0x1b8] sm:$0xff] %vm3055_vm1, %v3155_v27 }
 0x31f   : > { %v3003_v41 = vadd.f32 %v2939_v40, %v2881_v25  ;;  %v3138_v42 = vadd.f32 %v2937_v26, %v2883_v39  ;;  %v2166_v17 = vpop.trf.xlu0  ;;  %v3020_v26 = vadd.f32 %v2956_v20, %v3675_v23 }
 0x320   : > { %3401 = vmatmul.msk.f32.gmra.mxu2 %vm1236_vm0, %v2166_v17  ;;  %v2769_v24 = vpop.f32.mrf.mxu2 }
 0x321   : > { %3068 = vst.msk [vmem:[%s3638_s26 + $0xc0] sm:$0xff] %vm3055_vm1, %v3003_v41  ;;  %v2957_v37 = vmul.f32 0.75, %v2769_v24  ;;  %v3122_v38 = vmul.f32 0.25, %v2769_v24 }
 0x322   : > { %3431 = vst.msk [vmem:[%s3638_s26 + $0xb0] sm:$0xff] %vm3055_vm1, %v3138_v42 }
 0x323   : > { %3085 = vst.msk [vmem:[%s3638_s26 + $0x1c8] sm:$0xff] %vm3055_vm1, %v3020_v26  ;;  %v3021_v41 = vadd.f32 %v2957_v37, %v2897_v5  ;;  %v3156_v42 = vadd.f32 %v3122_v38, %v2955_v6  ;;  %v3158_v43 = vadd.f32 %v3122_v38, %v2957_v37 }
 0x324   : > { %v2718_v45 = vpop.f32.mrf.mxu1 }
 0x325   : > { %v2884_v46 = vmul.f32 0.25, %v2718_v45  ;;  %v2940_v47 = vmul.f32 0.75, %v2718_v45  ;;  %3086 = vst.msk [vmem:[%s3638_s26 + $0x1e0] sm:$0xff] %vm3055_vm1, %v3021_v41 }
 0x326   : > { %3449 = vst.msk [vmem:[%s3638_s26 + $0x1d0] sm:$0xff] %vm3055_vm1, %v3156_v42 }
 0x327   : > { %v3004_v48 = vadd.f32 %v2940_v47, %v2882_v32  ;;  %v3139_v49 = vadd.f32 %v2938_v33, %v2884_v46  ;;  %v2167_v29 = vpop.trf.xlu0  ;;  %3451 = vst.msk [vmem:[%s3638_s26 + $0x1f0] sm:$0xff] %vm3055_vm1, %v3158_v43 }
 0x328   : > { %3402 = vmatmul.msk.f32.gmra.mxu2 %vm1236_vm0, %v2167_v29  ;;  %v2772_v45 = vpop.f32.mrf.mxu2 }
 0x329   : > { %3069 = vst.msk [vmem:[%s3638_s26 + $0xc8] sm:$0xff] %vm3055_vm1, %v3004_v48  ;;  %v2958_v48 = vmul.f32 0.75, %v2772_v45 }
 0x32a   : > { %3432 = vst.msk [vmem:[%s3638_s26 + $0xb8] sm:$0xff] %vm3055_vm1, %v3139_v49  ;;  %v3123_v49 = vmul.f32 0.25, %v2772_v45 }
 0x32c   : > { %v2721_v52 = vpop.f32.mrf.mxu1 }
 0x32d   : > { %v2941_v53 = vmul.f32 0.75, %v2721_v52  ;;  %v3120_v54 = vmul.f32 0.25, %v2721_v52  ;;  %v3022_v52 = vadd.f32 %v2958_v48, %v2898_v19 }
 0x32f   : > { %v3005_v55 = vadd.f32 %v2941_v53, %v2883_v39  ;;  %v3140_v56 = vadd.f32 %v3120_v54, %v2939_v40  ;;  %v3142_v57 = vadd.f32 %v3120_v54, %v2941_v53  ;;  %v3157_v53 = vadd.f32 %v3123_v49, %v2956_v20  ;;  %3087 = vst.msk [vmem:[%s3638_s26 + $0x1e8] sm:$0xff] %vm3055_vm1, %v3022_v52 }
 0x330   : > { %v3159_v54 = vadd.f32 %v3123_v49, %v2958_v48 }
 0x331   : > { %3070 = vst.msk [vmem:[%s3638_s26 + $0xe0] sm:$0xff] %vm3055_vm1, %v3005_v55 }
 0x332   : > { %3433 = vst.msk [vmem:[%s3638_s26 + $0xd0] sm:$0xff] %vm3055_vm1, %v3140_v56  ;;  %v2775_v56 = vpop.f32.mrf.mxu2 }
 0x333   : > { %3435 = vst.msk [vmem:[%s3638_s26 + $0xf0] sm:$0xff] %vm3055_vm1, %v3142_v57  ;;  %v2899_v59 = vmul.f32 0.25, %v2775_v56 }
 0x334   : > { %v2724_v60 = vpop.f32.mrf.mxu1  ;;  %3450 = vst.msk [vmem:[%s3638_s26 + $0x1d8] sm:$0xff] %vm3055_vm1, %v3157_v53 }
 0x335   : > { %v2942_v61 = vmul.f32 0.75, %v2724_v60  ;;  %v3121_v62 = vmul.f32 0.25, %v2724_v60  ;;  %3452 = vst.msk [vmem:[%s3638_s26 + $0x1f8] sm:$0xff] %vm3055_vm1, %v3159_v54  ;;  %v2959_v60 = vmul.f32 0.75, %v2775_v56 }
 0x337   : > { %v3006_v63 = vadd.f32 %v2942_v61, %v2884_v46  ;;  %v3141_v0 = vadd.f32 %v3121_v62, %v2940_v47  ;;  %v3143_v1 = vadd.f32 %v3121_v62, %v2942_v61  ;;  %v2823_v61 = vpop.f32.mrf.mxu3  ;;  %v3023_v2 = vadd.f32 %v2959_v60, %v2899_v59 }
 0x338   : > { %v2913_v62 = vmul.f32 0.25, %v2823_v61 }
 0x339   : > { %3071 = vst.msk [vmem:[%s3638_s26 + $0xe8] sm:$0xff] %vm3055_vm1, %v3006_v63  ;;  %v2975_v63 = vmul.f32 0.75, %v2823_v61 }
 0x33a   : > { %3434 = vst.msk [vmem:[%s3638_s26 + $0xd8] sm:$0xff] %vm3055_vm1, %v3141_v0  ;;  %v2778_v5 = vpop.f32.mrf.mxu2 }
 0x33b   : > { %3436 = vst.msk [vmem:[%s3638_s26 + $0xf8] sm:$0xff] %vm3055_vm1, %v3143_v1  ;;  %v3039_v3 = vadd.f32 %v2975_v63, %v2913_v62 }
 0x33c   : > { %v2727_v7 = vpop.f32.mrf.mxu1  ;;  %3088 = vst.msk [vmem:[%s3638_s26 + $0x200] sm:$0xff] %vm3055_vm1, %v3023_v2 }
 0x33d   : > { %v2885_v12 = vmul.f32 0.25, %v2727_v7  ;;  %v2943_v13 = vmul.f32 0.75, %v2727_v7  ;;  %3104 = vst.msk [vmem:[%s3638_s26 + $0x300] sm:$0xff] %vm3055_vm1, %v3039_v3 }
 0x33f   : > { %v3007_v16 = vadd.f32 %v2943_v13, %v2885_v12  ;;  %v2826_v14 = vpop.f32.mrf.mxu3 }
 0x340   : > { %v2914_v15 = vmul.f32 0.25, %v2826_v14 }
 0x341   : > { %3072 = vst.msk [vmem:[%s3638_s26 + $0x100] sm:$0xff] %vm3055_vm1, %v3007_v16  ;;  %v2976_v16 = vmul.f32 0.75, %v2826_v14 }
 0x344   : > { %v2730_v25 = vpop.f32.mrf.mxu1 }
 0x345   : > { %v2886_v10 = vmul.f32 0.25, %v2730_v25  ;;  %v2944_v11 = vmul.f32 0.75, %v2730_v25 }
 0x347   : > { %v3008_v28 = vadd.f32 %v2944_v11, %v2886_v10 }
 0x349   : > { %3073 = vst.msk [vmem:[%s3638_s26 + $0x108] sm:$0xff] %vm3055_vm1, %v3008_v28 }
 0x34c   : > { %v2733_v30 = vpop.f32.mrf.mxu1 }
 0x34d   : > { %v2887_v31 = vmul.f32 0.25, %v2733_v30  ;;  %v2945_v32 = vmul.f32 0.75, %v2733_v30 }
 0x34f   : > { %v3009_v33 = vadd.f32 %v2945_v32, %v2885_v12  ;;  %v3144_v34 = vadd.f32 %v2943_v13, %v2887_v31  ;;  %v2900_v12 = vmul.f32 0.25, %v2778_v5  ;;  %v2960_v13 = vmul.f32 0.75, %v2778_v5 }
 0x351   : > { %3074 = vst.msk [vmem:[%s3638_s26 + $0x120] sm:$0xff] %vm3055_vm1, %v3009_v33 }
 0x352   : > { %3437 = vst.msk [vmem:[%s3638_s26 + $0x110] sm:$0xff] %vm3055_vm1, %v3144_v34 }
 0x353   : > { %v2781_v27 = vpop.f32.mrf.mxu2  ;;  %v2829_v29 = vpop.f32.mrf.mxu3 }
 0x354   : > { %v2736_v23 = vpop.f32.mrf.mxu1  ;;  %v2901_v30 = vmul.f32 0.25, %v2781_v27 }
 0x355   : > { %v2888_v35 = vmul.f32 0.25, %v2736_v23  ;;  %v2946_v36 = vmul.f32 0.75, %v2736_v23  ;;  %v2977_v23 = vmul.f32 0.75, %v2829_v29 }
 0x357   : > { %v3010_v39 = vadd.f32 %v2946_v36, %v2886_v10  ;;  %v3145_v40 = vadd.f32 %v2944_v11, %v2888_v35  ;;  %v3024_v10 = vadd.f32 %v2960_v13, %v2900_v12  ;;  %v3040_v11 = vadd.f32 %v2976_v16, %v2914_v15 }
 0x358   : > { %v3041_v38 = vadd.f32 %v2977_v23, %v2913_v62 }
 0x359   : > { %3075 = vst.msk [vmem:[%s3638_s26 + $0x128] sm:$0xff] %vm3055_vm1, %v3010_v39 }
 0x35a   : > { %3438 = vst.msk [vmem:[%s3638_s26 + $0x118] sm:$0xff] %vm3055_vm1, %v3145_v40 }
 0x35b   : > { %3089 = vst.msk [vmem:[%s3638_s26 + $0x208] sm:$0xff] %vm3055_vm1, %v3024_v10  ;;  %v2784_v39 = vpop.f32.mrf.mxu2  ;;  %v2832_v42 = vpop.f32.mrf.mxu3 }
 0x35c   : > { %v2739_v44 = vpop.f32.mrf.mxu1  ;;  %3105 = vst.msk [vmem:[%s3638_s26 + $0x308] sm:$0xff] %vm3055_vm1, %v3040_v11  ;;  %v2902_v40 = vmul.f32 0.25, %v2784_v39  ;;  %v2962_v41 = vmul.f32 0.75, %v2784_v39  ;;  %v2916_v43 = vmul.f32 0.25, %v2832_v42 }
 0x35d   : > { %v2889_v46 = vmul.f32 0.25, %v2739_v44  ;;  %v2947_v47 = vmul.f32 0.75, %v2739_v44  ;;  %v2978_v44 = vmul.f32 0.75, %v2832_v42  ;;  %3106 = vst.msk [vmem:[%s3638_s26 + $0x320] sm:$0xff] %vm3055_vm1, %v3041_v38 }
 0x35e   : > { %v3177_v49 = vadd.f32 %v2976_v16, %v2916_v43 }
 0x35f   : > { %v3011_v50 = vadd.f32 %v2947_v47, %v2887_v31  ;;  %v3146_v51 = vadd.f32 %v2945_v32, %v2889_v46  ;;  %v3042_v48 = vadd.f32 %v2978_v44, %v2914_v15 }
 0x360   : > { %3470 = vst.msk [vmem:[%s3638_s26 + $0x318] sm:$0xff] %vm3055_vm1, %v3177_v49 }
 0x361   : > { %3076 = vst.msk [vmem:[%s3638_s26 + $0x140] sm:$0xff] %vm3055_vm1, %v3011_v50 }
 0x362   : > { %3439 = vst.msk [vmem:[%s3638_s26 + $0x130] sm:$0xff] %vm3055_vm1, %v3146_v51 }
 0x363   : > { %3107 = vst.msk [vmem:[%s3638_s26 + $0x328] sm:$0xff] %vm3055_vm1, %v3042_v48  ;;  %v2787_v51 = vpop.f32.mrf.mxu2  ;;  %v2835_v54 = vpop.f32.mrf.mxu3 }
 0x364   : > { %v2742_v55 = vpop.f32.mrf.mxu1  ;;  %v2903_v52 = vmul.f32 0.25, %v2787_v51  ;;  %v2963_v53 = vmul.f32 0.75, %v2787_v51  ;;  %v2979_v56 = vmul.f32 0.75, %v2835_v54 }
 0x365   : > { %v2890_v57 = vmul.f32 0.25, %v2742_v55  ;;  %v2948_v58 = vmul.f32 0.75, %v2742_v55  ;;  %v2917_v55 = vmul.f32 0.25, %v2835_v54 }
 0x367   : > { %v3012_v0 = vadd.f32 %v2948_v58, %v2888_v35  ;;  %v3147_v1 = vadd.f32 %v2946_v36, %v2890_v57  ;;  %v2915_v35 = vmul.f32 0.25, %v2829_v29  ;;  %v3178_v61 = vadd.f32 %v2977_v23, %v2917_v55 }
 0x369   : > { %3077 = vst.msk [vmem:[%s3638_s26 + $0x148] sm:$0xff] %vm3055_vm1, %v3012_v0 }
 0x36a   : > { %3440 = vst.msk [vmem:[%s3638_s26 + $0x138] sm:$0xff] %vm3055_vm1, %v3147_v1 }
 0x36b   : > { %3471 = vst.msk [vmem:[%s3638_s26 + $0x330] sm:$0xff] %vm3055_vm1, %v3178_v61  ;;  %v2790_v62 = vpop.f32.mrf.mxu2  ;;  %v2838_v1 = vpop.f32.mrf.mxu3 }
 0x36c   : > { %v2745_v4 = vpop.f32.mrf.mxu1  ;;  %v2964_v0 = vmul.f32 0.75, %v2790_v62  ;;  %v2918_v2 = vmul.f32 0.25, %v2838_v1  ;;  %v2980_v3 = vmul.f32 0.75, %v2838_v1 }
 0x36d   : > { %v2891_v6 = vmul.f32 0.25, %v2745_v4  ;;  %v2949_v7 = vmul.f32 0.75, %v2745_v4 }
 0x36e   : > { %v3028_v4 = vadd.f32 %v2964_v0, %v2902_v40 }
 0x36f   : > { %v3013_v17 = vadd.f32 %v2949_v7, %v2889_v46  ;;  %v3015_v18 = vadd.f32 %v3652_v9, %v2891_v6  ;;  %v3148_v19 = vadd.f32 %v2947_v47, %v2891_v6  ;;  %v2422_v20 = vpop.trf.xlu1  ;;  %v3150_v25 = vadd.f32 %v2949_v7, %v3650_v8 }
 0x370   : > { %3417 = vmatmul.msk.f32.gmra.mxu3 %vm1236_vm0, %v2422_v20  ;;  %v2961_v8 = vmul.f32 0.75, %v2781_v27  ;;  %v3026_v46 = vadd.f32 %v2962_v41, %v2900_v12  ;;  %v3161_v47 = vadd.f32 %v2960_v13, %v2902_v40  ;;  %v3044_v6 = vadd.f32 %v2980_v3, %v2916_v43  ;;  %3093 = vst.msk [vmem:[%s3638_s26 + $0x248] sm:$0xff] %vm3055_vm1, %v3028_v4 }
 0x371   : > { %3078 = vst.msk [vmem:[%s3638_s26 + $0x160] sm:$0xff] %vm3055_vm1, %v3013_v17  ;;  %v3179_v7 = vadd.f32 %v2978_v44, %v2918_v2 }
 0x372   : > { %3080 = vst.msk [vmem:[%s3638_s26 + $0x180] sm:$0xff] %vm3055_vm1, %v3015_v18  ;;  %v3025_v37 = vadd.f32 %v2961_v8, %v2899_v59  ;;  %v3162_v59 = vadd.f32 %v2961_v8, %v2903_v52 }
 0x373   : > { %3441 = vst.msk [vmem:[%s3638_s26 + $0x150] sm:$0xff] %vm3055_vm1, %v3148_v19  ;;  %v2793_v12 = vpop.f32.mrf.mxu2  ;;  %v2841_v15 = vpop.f32.mrf.mxu3 }
 0x374   : > { %3443 = vst.msk [vmem:[%s3638_s26 + $0x170] sm:$0xff] %vm3055_vm1, %v3150_v25  ;;  %v2748_v26 = vpop.f32.mrf.mxu1  ;;  %v2905_v13 = vmul.f32 0.25, %v2793_v12  ;;  %v2965_v14 = vmul.f32 0.75, %v2793_v12  ;;  %v2919_v16 = vmul.f32 0.25, %v2841_v15  ;;  %v2981_v17 = vmul.f32 0.75, %v2841_v15 }
 0x375   : > { %v2892_v9 = vmul.f32 0.25, %v2748_v26  ;;  %v2950_v28 = vmul.f32 0.75, %v2748_v26  ;;  %3090 = vst.msk [vmem:[%s3638_s26 + $0x220] sm:$0xff] %vm3055_vm1, %v3025_v37 }
 0x376   : > { %3091 = vst.msk [vmem:[%s3638_s26 + $0x228] sm:$0xff] %vm3055_vm1, %v3026_v46  ;;  %v3029_v18 = vadd.f32 %v2965_v14, %v2903_v52  ;;  %v3164_v19 = vadd.f32 %v2963_v53, %v2905_v13  ;;  %v3045_v20 = vadd.f32 %v2981_v17, %v2917_v55  ;;  %v3180_v25 = vadd.f32 %v2979_v56, %v2919_v16 }
 0x377   : > { %v3014_v31 = vadd.f32 %v2950_v28, %v2890_v57  ;;  %v3016_v32 = vadd.f32 %v3673_v22, %v2892_v9  ;;  %v3149_v33 = vadd.f32 %v2948_v58, %v2892_v9  ;;  %v2423_v34 = vpop.trf.xlu1  ;;  %v3151_v24 = vadd.f32 %v2950_v28, %v3671_v21  ;;  %3454 = vst.msk [vmem:[%s3638_s26 + $0x218] sm:$0xff] %vm3055_vm1, %v3161_v47 }
 0x378   : > { %3418 = vmatmul.msk.f32.gmra.mxu3 %vm1236_vm0, %v2423_v34  ;;  %v3160_v22 = vadd.f32 %v2959_v60, %v2901_v30  ;;  %v3176_v21 = vadd.f32 %v2975_v63, %v2915_v35  ;;  %v3027_v58 = vadd.f32 %v2963_v53, %v2901_v30  ;;  %v3043_v60 = vadd.f32 %v2979_v56, %v2915_v35 }
 0x379   : > { %3079 = vst.msk [vmem:[%s3638_s26 + $0x168] sm:$0xff] %vm3055_vm1, %v3014_v31  ;;  %v2198_v36 = vpop.trf.xlu0  ;;  %v2904_v63 = vmul.f32 0.25, %v2790_v62 }
 0x37a   : > { %3081 = vst.msk [vmem:[%s3638_s26 + $0x188] sm:$0xff] %vm3055_vm1, %v3016_v32  ;;  %3403 = vmatmul.msk.f32.gmra.mxu2 %vm1236_vm0, %v2198_v36 }
 0x37b   : > { %3442 = vst.msk [vmem:[%s3638_s26 + $0x158] sm:$0xff] %vm3055_vm1, %v3149_v33  ;;  %v3163_v5 = vadd.f32 %v2962_v41, %v2904_v63  ;;  %v2796_v10 = vpop.f32.mrf.mxu2  ;;  %v2844_v27 = vpop.f32.mrf.mxu3 }
 0x37c   : > { %3444 = vst.msk [vmem:[%s3638_s26 + $0x178] sm:$0xff] %vm3055_vm1, %v3151_v24  ;;  %v2906_v11 = vmul.f32 0.25, %v2796_v10  ;;  %v2966_v26 = vmul.f32 0.75, %v2796_v10  ;;  %v2920_v9 = vmul.f32 0.25, %v2844_v27  ;;  %v2982_v28 = vmul.f32 0.75, %v2844_v27 }
 0x37d   : > { %3453 = vst.msk [vmem:[%s3638_s26 + $0x210] sm:$0xff] %vm3055_vm1, %v3160_v22 }
 0x37e   : > { %3469 = vst.msk [vmem:[%s3638_s26 + $0x310] sm:$0xff] %vm3055_vm1, %v3176_v21  ;;  %v3030_v8 = vadd.f32 %v2966_v26, %v2904_v63  ;;  %v3165_v29 = vadd.f32 %v2964_v0, %v2906_v11  ;;  %v3046_v30 = vadd.f32 %v2982_v28, %v2918_v2  ;;  %v3181_v31 = vadd.f32 %v2980_v3, %v2920_v9 }
 0x37f   : > { %v2454_v45 = vpop.trf.xlu1  ;;  %3092 = vst.msk [vmem:[%s3638_s26 + $0x240] sm:$0xff] %vm3055_vm1, %v3027_v58 }
 0x380   : > { %3419 = vmatmul.msk.f32.gmra.mxu3 %vm1236_vm0, %v2454_v45  ;;  %3455 = vst.msk [vmem:[%s3638_s26 + $0x230] sm:$0xff] %vm3055_vm1, %v3162_v59 }
 0x381   : > { %v2199_v50 = vpop.trf.xlu0  ;;  %3108 = vst.msk [vmem:[%s3638_s26 + $0x340] sm:$0xff] %vm3055_vm1, %v3043_v60 }
 0x382   : > { %3404 = vmatmul.msk.f32.gmra.mxu2 %vm1236_vm0, %v2199_v50  ;;  %3456 = vst.msk [vmem:[%s3638_s26 + $0x238] sm:$0xff] %vm3055_vm1, %v3163_v5 }
 0x383   : > { %3109 = vst.msk [vmem:[%s3638_s26 + $0x348] sm:$0xff] %vm3055_vm1, %v3044_v6  ;;  %v2799_v32 = vpop.f32.mrf.mxu2  ;;  %v2847_v23 = vpop.f32.mrf.mxu3 }
 0x384   : > { %3472 = vst.msk [vmem:[%s3638_s26 + $0x338] sm:$0xff] %vm3055_vm1, %v3179_v7  ;;  %v2907_v33 = vmul.f32 0.25, %v2799_v32  ;;  %v2967_v34 = vmul.f32 0.75, %v2799_v32  ;;  %v2921_v24 = vmul.f32 0.25, %v2847_v23  ;;  %v2983_v35 = vmul.f32 0.75, %v2847_v23 }
 0x385   : > { %3094 = vst.msk [vmem:[%s3638_s26 + $0x260] sm:$0xff] %vm3055_vm1, %v3029_v18 }
 0x386   : > { %3457 = vst.msk [vmem:[%s3638_s26 + $0x250] sm:$0xff] %vm3055_vm1, %v3164_v19  ;;  %v3031_v36 = vadd.f32 %v2967_v34, %v2905_v13  ;;  %v3166_v37 = vadd.f32 %v2965_v14, %v2907_v33  ;;  %v3047_v22 = vadd.f32 %v2983_v35, %v2919_v16  ;;  %v3182_v38 = vadd.f32 %v2981_v17, %v2921_v24 }
 0x387   : > { %v2455_v57 = vpop.trf.xlu1  ;;  %3110 = vst.msk [vmem:[%s3638_s26 + $0x360] sm:$0xff] %vm3055_vm1, %v3045_v20 }
 0x388   : > { %3420 = vmatmul.msk.f32.gmra.mxu3 %vm1236_vm0, %v2455_v57  ;;  %3473 = vst.msk [vmem:[%s3638_s26 + $0x350] sm:$0xff] %vm3055_vm1, %v3180_v25 }
 0x389   : > { %3095 = vst.msk [vmem:[%s3638_s26 + $0x268] sm:$0xff] %vm3055_vm1, %v3030_v8 }
 0x38a   : > { %3458 = vst.msk [vmem:[%s3638_s26 + $0x258] sm:$0xff] %vm3055_vm1, %v3165_v29 }
 0x38b   : > { %3111 = vst.msk [vmem:[%s3638_s26 + $0x368] sm:$0xff] %vm3055_vm1, %v3046_v30  ;;  %v2802_v21 = vpop.f32.mrf.mxu2  ;;  %v2850_v41 = vpop.f32.mrf.mxu3 }
 0x38c   : > { %3474 = vst.msk [vmem:[%s3638_s26 + $0x358] sm:$0xff] %vm3055_vm1, %v3181_v31  ;;  %v2908_v39 = vmul.f32 0.25, %v2802_v21  ;;  %v2968_v40 = vmul.f32 0.75, %v2802_v21  ;;  %v2922_v42 = vmul.f32 0.25, %v2850_v41  ;;  %v2984_v43 = vmul.f32 0.75, %v2850_v41 }
 0x38d   : > { %3096 = vst.msk [vmem:[%s3638_s26 + $0x280] sm:$0xff] %vm3055_vm1, %v3031_v36 }
 0x38e   : > { %3459 = vst.msk [vmem:[%s3638_s26 + $0x270] sm:$0xff] %vm3055_vm1, %v3166_v37  ;;  %v3032_v44 = vadd.f32 %v2968_v40, %v2906_v11  ;;  %v3167_v45 = vadd.f32 %v2966_v26, %v2908_v39  ;;  %v3048_v46 = vadd.f32 %v2984_v43, %v2920_v9  ;;  %v3183_v47 = vadd.f32 %v2982_v28, %v2922_v42 }
 0x38f   : > { %3112 = vst.msk [vmem:[%s3638_s26 + $0x380] sm:$0xff] %vm3055_vm1, %v3047_v22 }
 0x390   : > { %3475 = vst.msk [vmem:[%s3638_s26 + $0x370] sm:$0xff] %vm3055_vm1, %v3182_v38 }
 0x391   : > { %3097 = vst.msk [vmem:[%s3638_s26 + $0x288] sm:$0xff] %vm3055_vm1, %v3032_v44 }
 0x392   : > { %3460 = vst.msk [vmem:[%s3638_s26 + $0x278] sm:$0xff] %vm3055_vm1, %v3167_v45 }
 0x393   : > { %3113 = vst.msk [vmem:[%s3638_s26 + $0x388] sm:$0xff] %vm3055_vm1, %v3048_v46  ;;  %v2805_v48 = vpop.f32.mrf.mxu2  ;;  %v2853_v51 = vpop.f32.mrf.mxu3 }
 0x394   : > { %3476 = vst.msk [vmem:[%s3638_s26 + $0x378] sm:$0xff] %vm3055_vm1, %v3183_v47  ;;  %v2909_v49 = vmul.f32 0.25, %v2805_v48  ;;  %v2969_v50 = vmul.f32 0.75, %v2805_v48  ;;  %v2923_v52 = vmul.f32 0.25, %v2853_v51  ;;  %v2985_v53 = vmul.f32 0.75, %v2853_v51 }
 0x396   : > { %v3033_v54 = vadd.f32 %v2969_v50, %v2907_v33  ;;  %v3168_v55 = vadd.f32 %v2967_v34, %v2909_v49  ;;  %v3049_v56 = vadd.f32 %v2985_v53, %v2921_v24  ;;  %v3184_v57 = vadd.f32 %v2983_v35, %v2923_v52 }
 0x398   : > { %3098 = vst.msk [vmem:[%s3638_s26 + $0x2a0] sm:$0xff] %vm3055_vm1, %v3033_v54 }
 0x399   : > { %3461 = vst.msk [vmem:[%s3638_s26 + $0x290] sm:$0xff] %vm3055_vm1, %v3168_v55 }
 0x39a   : > { %3114 = vst.msk [vmem:[%s3638_s26 + $0x3a0] sm:$0xff] %vm3055_vm1, %v3049_v56 }
 0x39b   : > { %3477 = vst.msk [vmem:[%s3638_s26 + $0x390] sm:$0xff] %vm3055_vm1, %v3184_v57  ;;  %v2808_v58 = vpop.f32.mrf.mxu2  ;;  %v2856_v61 = vpop.f32.mrf.mxu3 }
 0x39c   : > { %v2910_v59 = vmul.f32 0.25, %v2808_v58  ;;  %v2970_v60 = vmul.f32 0.75, %v2808_v58  ;;  %v2924_v62 = vmul.f32 0.25, %v2856_v61  ;;  %v2986_v63 = vmul.f32 0.75, %v2856_v61 }
 0x39e   : > { %v3034_v0 = vadd.f32 %v2970_v60, %v2908_v39  ;;  %v3169_v1 = vadd.f32 %v2968_v40, %v2910_v59  ;;  %v3050_v2 = vadd.f32 %v2986_v63, %v2922_v42  ;;  %v3185_v3 = vadd.f32 %v2984_v43, %v2924_v62 }
 0x3a0   : > { %3099 = vst.msk [vmem:[%s3638_s26 + $0x2a8] sm:$0xff] %vm3055_vm1, %v3034_v0 }
 0x3a1   : > { %3462 = vst.msk [vmem:[%s3638_s26 + $0x298] sm:$0xff] %vm3055_vm1, %v3169_v1 }
 0x3a2   : > { %3115 = vst.msk [vmem:[%s3638_s26 + $0x3a8] sm:$0xff] %vm3055_vm1, %v3050_v2 }
 0x3a3   : > { %3478 = vst.msk [vmem:[%s3638_s26 + $0x398] sm:$0xff] %vm3055_vm1, %v3185_v3  ;;  %v2811_v4 = vpop.f32.mrf.mxu2 }
 0x3a4   : > { %v2911_v5 = vmul.f32 0.25, %v2811_v4  ;;  %v2971_v6 = vmul.f32 0.75, %v2811_v4 }
 0x3a6   : > { %v3035_v7 = vadd.f32 %v2971_v6, %v2909_v49  ;;  %v3170_v12 = vadd.f32 %v2969_v50, %v2911_v5 }
 0x3a8   : > { %3100 = vst.msk [vmem:[%s3638_s26 + $0x2c0] sm:$0xff] %vm3055_vm1, %v3035_v7 }
 0x3a9   : > { %3463 = vst.msk [vmem:[%s3638_s26 + $0x2b0] sm:$0xff] %vm3055_vm1, %v3170_v12 }
 0x3ab   : > { %v2814_v13 = vpop.f32.mrf.mxu2 }
 0x3ac   : > { %v2912_v14 = vmul.f32 0.25, %v2814_v13  ;;  %v2972_v15 = vmul.f32 0.75, %v2814_v13 }
 0x3ae   : > { %v3036_v16 = vadd.f32 %v2972_v15, %v2910_v59  ;;  %v3171_v17 = vadd.f32 %v2970_v60, %v2912_v14 }
 0x3b0   : > { %3101 = vst.msk [vmem:[%s3638_s26 + $0x2c8] sm:$0xff] %vm3055_vm1, %v3036_v16 }
 0x3b1   : > { %3464 = vst.msk [vmem:[%s3638_s26 + $0x2b8] sm:$0xff] %vm3055_vm1, %v3171_v17 }
 0x3f3   : > { %v2859_v18 = vpop.f32.mrf.mxu3 }
 0x3f4   : > { %v2925_v19 = vmul.f32 0.25, %v2859_v18  ;;  %v2987_v20 = vmul.f32 0.75, %v2859_v18 }
 0x3f6   : > { %v3051_v25 = vadd.f32 %v2987_v20, %v2923_v52  ;;  %v3186_v10 = vadd.f32 %v2985_v53, %v2925_v19 }
 0x3f8   : > { %3116 = vst.msk [vmem:[%s3638_s26 + $0x3c0] sm:$0xff] %vm3055_vm1, %v3051_v25 }
 0x3f9   : > { %3479 = vst.msk [vmem:[%s3638_s26 + $0x3b0] sm:$0xff] %vm3055_vm1, %v3186_v10 }
 0x3fb   : > { %v2862_v11 = vpop.f32.mrf.mxu3 }
 0x3fc   : > { %v2926_v26 = vmul.f32 0.25, %v2862_v11  ;;  %v2988_v27 = vmul.f32 0.75, %v2862_v11 }
 0x3fd   : > { %v2817_v9 = vpop.f32.mrf.mxu2 }
 0x3fe   : > { %v3052_v28 = vadd.f32 %v2988_v27, %v2924_v62  ;;  %v3187_v8 = vadd.f32 %v2986_v63, %v2926_v26  ;;  %v2973_v29 = vmul.f32 0.75, %v2817_v9  ;;  %v3124_v30 = vmul.f32 0.25, %v2817_v9 }
 0x400   : > { %3117 = vst.msk [vmem:[%s3638_s26 + $0x3c8] sm:$0xff] %vm3055_vm1, %v3052_v28  ;;  %v3037_v31 = vadd.f32 %v2973_v29, %v2911_v5  ;;  %v3172_v32 = vadd.f32 %v3124_v30, %v2971_v6  ;;  %v3174_v33 = vadd.f32 %v3124_v30, %v2973_v29 }
 0x401   : > { %3480 = vst.msk [vmem:[%s3638_s26 + $0x3b8] sm:$0xff] %vm3055_vm1, %v3187_v8 }
 0x402   : > { %3102 = vst.msk [vmem:[%s3638_s26 + $0x2e0] sm:$0xff] %vm3055_vm1, %v3037_v31 }
 0x403   : > { %3465 = vst.msk [vmem:[%s3638_s26 + $0x2d0] sm:$0xff] %vm3055_vm1, %v3172_v32  ;;  %v2865_v34 = vpop.f32.mrf.mxu3 }
 0x404   : > { %3467 = vst.msk [vmem:[%s3638_s26 + $0x2f0] sm:$0xff] %vm3055_vm1, %v3174_v33  ;;  %v2989_v23 = vmul.f32 0.75, %v2865_v34  ;;  %v3126_v24 = vmul.f32 0.25, %v2865_v34 }
 0x405   : > { %v2820_v35 = vpop.f32.mrf.mxu2 }
 0x406   : > { %v3053_v36 = vadd.f32 %v2989_v23, %v2925_v19  ;;  %v3188_v37 = vadd.f32 %v3126_v24, %v2987_v20  ;;  %v3190_v22 = vadd.f32 %v3126_v24, %v2989_v23  ;;  %v2974_v38 = vmul.f32 0.75, %v2820_v35 }
 0x407   : > { %v3125_v21 = vmul.f32 0.25, %v2820_v35 }
 0x408   : > { %3118 = vst.msk [vmem:[%s3638_s26 + $0x3e0] sm:$0xff] %vm3055_vm1, %v3053_v36  ;;  %v3038_v39 = vadd.f32 %v2974_v38, %v2912_v14 }
 0x409   : > { %3481 = vst.msk [vmem:[%s3638_s26 + $0x3d0] sm:$0xff] %vm3055_vm1, %v3188_v37  ;;  %v3173_v40 = vadd.f32 %v3125_v21, %v2972_v15  ;;  %v3175_v41 = vadd.f32 %v3125_v21, %v2974_v38 }
 0x40a   : > { %3483 = vst.msk [vmem:[%s3638_s26 + $0x3f0] sm:$0xff] %vm3055_vm1, %v3190_v22 }
 0x40b   : > { %3103 = vst.msk [vmem:[%s3638_s26 + $0x2e8] sm:$0xff] %vm3055_vm1, %v3038_v39  ;;  %v2868_v42 = vpop.f32.mrf.mxu3 }
 0x40c   : > { %3466 = vst.msk [vmem:[%s3638_s26 + $0x2d8] sm:$0xff] %vm3055_vm1, %v3173_v40  ;;  %v2990_v43 = vmul.f32 0.75, %v2868_v42  ;;  %v3127_v44 = vmul.f32 0.25, %v2868_v42 }
 0x40d   : > { %3468 = vst.msk [vmem:[%s3638_s26 + $0x2f8] sm:$0xff] %vm3055_vm1, %v3175_v41 }
 0x40e   : > { %v3054_v45 = vadd.f32 %v2990_v43, %v2926_v26  ;;  %v3189_v46 = vadd.f32 %v3127_v44, %v2988_v27  ;;  %v3191_v47 = vadd.f32 %v3127_v44, %v2990_v43 }
 0x410   : > { %3119 = vst.msk [vmem:[%s3638_s26 + $0x3e8] sm:$0xff] %vm3055_vm1, %v3054_v45 }
 0x411   : > { %3482 = vst.msk [vmem:[%s3638_s26 + $0x3d8] sm:$0xff] %vm3055_vm1, %v3189_v46 }
 0x412   : > { %3484 = vst.msk [vmem:[%s3638_s26 + $0x3f8] sm:$0xff] %vm3055_vm1, %v3191_v47 }
 0x413 PF: > { %s13_s12 = sadd.s32 1, %s3506_s12  }
 0x414   : > { %p10_p4 = scmp.ge.s32.totalorder %s13_s12, 4  }
 0x416   :  { %12 = sbr.rel (!%p10_p4) target bundleno = 1 (0x1), region = 63 }

</bundles_post_ra>
